<compile_context>
chip_gen: v7x
topology: tpu7x:2x2x1
jax: 0.10.0
libtpu: 0.0.40
codegen_flags: <defaults>
</compile_context>

<pallas_src>
import functools

import jax
import jax.numpy as jnp
from jax import lax
from jax.experimental import pallas as pl
from jax.experimental.pallas import tpu as pltpu


def _round_up(x, m):
    return ((x + m - 1) // m) * m


# ---------------------------------------------------------------------------
# Phase 1: per-sample stats.
#   loss_i = logsumexp(x_i) - x_i[t_i]
#   r_i    = ||softmax(x_i) - onehot(t_i)||^2 = sum_c p^2 - 2*p_t + 1  (in [0,2))
# r is kept unscaled (gsq_i = r_i / N^2 is applied in phase 2) to preserve f32
# precision for large N.
# ---------------------------------------------------------------------------
def _stats_kernel(logits_ref, target_ref, loss_ref, r_ref):
    x = logits_ref[...].astype(jnp.float32)                    # (T, C)
    tgt = target_ref[...]                                       # (T, 1) int32
    c_dim = x.shape[-1]

    # (1, C) class iota broadcast against (T, 1) targets (no full-width iota).
    cls = lax.broadcasted_iota(jnp.int32, (1, c_dim), 1)
    onehot = cls == tgt                                          # (T, C) bool

    m = jnp.max(x, axis=-1, keepdims=True)                       # (T, 1)
    ex = jnp.exp(x - m)                                          # (T, C)
    se = jnp.sum(ex, axis=-1, keepdims=True)                     # (T, 1)
    lse = m + jnp.log(se)                                        # (T, 1)
    tgt_logit = jnp.sum(jnp.where(onehot, x, 0.0), axis=-1, keepdims=True)

    loss = lse - tgt_logit                                       # per-sample CE

    # p_t via a tiny (T,1) exp; sum p^2 via sum(ex^2)/se^2 (exact divide,
    # no materialized softmax, no second one-hot pass).
    p_t = jnp.exp(tgt_logit - lse)
    sum_ex2 = jnp.sum(ex * ex, axis=-1, keepdims=True)
    sum_p2 = sum_ex2 / (se * se)
    r = sum_p2 - 2.0 * p_t + 1.0

    loss_ref[...] = loss
    r_ref[...] = r


# ---------------------------------------------------------------------------
# Phase 2: exact KKT solve of the QP + re-weighted mean, on lane-dense data.
#   w_i = max(0, gsq_i - delta) * scale,   sum_i w_i = N  (scale fixed exactly)
#   out = sum(loss * w_raw) / sum(w_raw)
# ---------------------------------------------------------------------------
def _qp_kernel(loss_ref, r_ref, out_ref, *, lamb, n, iters):
    rows, lanes = loss_ref.shape
    inv_n2 = 1.0 / (float(n) * float(n))
    target = 2.0 * lamb * float(n)

    row_id = lax.broadcasted_iota(jnp.int32, (rows, lanes), 0)
    lane_id = lax.broadcasted_iota(jnp.int32, (rows, lanes), 1)
    valid = (row_id * lanes + lane_id) < n

    loss = loss_ref[...]
    gsq_v = r_ref[...] * inv_n2
    sum_gsq = jnp.sum(jnp.where(valid, gsq_v, 0.0))
    # Padded rows get a very negative gsq: never the max, weight always 0.
    gsq = jnp.where(valid, gsq_v, -1e30)

    # s(delta) = sum max(0, gsq - delta) is decreasing.
    #   s(max_gsq) = 0 <= target;  s(mean_gsq - 2*lamb) >= target.
    hi = jnp.max(gsq)
    lo = sum_gsq * (1.0 / float(n)) - 2.0 * lamb

    def body(_, carry):
        lo_c, hi_c = carry
        mid = 0.5 * (lo_c + hi_c)
        s = jnp.sum(jnp.maximum(gsq - mid, 0.0))
        big = s > target
        return jnp.where(big, mid, lo_c), jnp.where(big, hi_c, mid)

    lo, hi = lax.fori_loop(0, iters, body, (lo, hi), unroll=4)

    # Use the feasible end of the bracket (sum >= target > 0); the exact
    # rescale w *= N / sum(w) folds into the final ratio.
    w = jnp.maximum(gsq - lo, 0.0)                  # pads -> 0
    num = jnp.sum(loss * w)
    den = jnp.sum(w)
    out_ref[0, 0] = num / den


def _pick_tile(n, c, itemsize):
    """Batch-tile rows and VMEM limit from a per-row working-set model."""
    c_pad = _round_up(c, 128)
    # per row of a tile: 2x double-buffered native-dtype logits block,
    # ~3 live (T, C) f32 temporaries, plus the lane-padded (T,1) column blocks
    # (targets in + loss/r out, double-buffered): 3 * 2 * 128 * 4 bytes.
    per_row = 2 * c_pad * itemsize + 3 * c_pad * 4 + 3 * 2 * 128 * 4
    try:
        phys = int(getattr(pltpu.get_tpu_info(), "vmem_capacity_bytes",
                           64 * 1024 * 1024))
    except Exception:  # no TPU info available at trace time
        phys = 64 * 1024 * 1024
    # v5e/v6e (128 MiB physical) -> 96 MiB limit; v7x (64 MiB) -> 48 MiB.
    vmem_limit = min(phys * 3 // 4, 96 * 1024 * 1024)
    budget = vmem_limit * 3 // 5          # headroom for compiler scratch
    tile = max(8, (budget // per_row) // 8 * 8)
    tile = min(tile, _round_up(n, 8))
    return int(tile), int(vmem_limit)


def low_loss(logits, target, lamb=0.1):
    """logits: (N, C) float (any float dtype), target: (N,) int -> scalar."""
    n, c = logits.shape
    itemsize = jnp.dtype(logits.dtype).itemsize
    tile_n, vmem_limit = _pick_tile(n, c, itemsize)
    n_pad = _round_up(n, tile_n)
    grid = n_pad // tile_n

    # TODO(synk): for vocab-scale C the class dim should also be tiled with an
    # online (flash-style) running max / sum-exp / sum-exp^2 accumulation.

    logits_p = logits                               # native dtype (bf16 stays bf16)
    target_p = target.astype(jnp.int32)
    if n_pad != n:
        logits_p = jnp.pad(logits_p, ((0, n_pad - n), (0, 0)))
        target_p = jnp.pad(target_p, (0, n_pad - n))
    target_p = target_p.reshape(n_pad, 1)

    cost = pl.CostEstimate(
        flops=10 * n_pad * c,
        transcendentals=n_pad * c,
        bytes_accessed=n_pad * c * itemsize + 12 * n_pad)

    loss_col, r_col = pl.pallas_call(
        _stats_kernel,
        out_shape=(jax.ShapeDtypeStruct((n_pad, 1), jnp.float32),
                   jax.ShapeDtypeStruct((n_pad, 1), jnp.float32)),
        grid=(grid,),
        in_specs=[pl.BlockSpec((tile_n, c), lambda i: (i, 0)),
                  pl.BlockSpec((tile_n, 1), lambda i: (i, 0))],
        out_specs=(pl.BlockSpec((tile_n, 1), lambda i: (i, 0)),
                   pl.BlockSpec((tile_n, 1), lambda i: (i, 0))),
        compiler_params=pltpu.CompilerParams(
            dimension_semantics=("parallel",),
            vmem_limit_bytes=vmem_limit),
        cost_estimate=cost,
    )(logits_p, target_p)

    # Free (contiguous) reshape to a lane-dense layout for the tiny QP phase.
    n_pad2 = _round_up(n_pad, 128)
    if n_pad2 != n_pad:
        loss_col = jnp.pad(loss_col, ((0, n_pad2 - n_pad), (0, 0)))
        r_col = jnp.pad(r_col, ((0, n_pad2 - n_pad), (0, 0)))
    rows = n_pad2 // 128
    loss2d = loss_col.reshape(rows, 128)
    r2d = r_col.reshape(rows, 128)

    # TODO(synk): for N large enough that 8*N bytes exceeds VMEM (~several
    # million samples), the bisection phase itself would need batch tiling.
    qp = functools.partial(_qp_kernel, lamb=float(lamb), n=int(n), iters=24)
    out = pl.pallas_call(
        qp,
        out_shape=jax.ShapeDtypeStruct((1, 1), jnp.float32),
        grid=(1,),
        in_specs=[pl.BlockSpec((rows, 128), lambda i: (0, 0)),
                  pl.BlockSpec((rows, 128), lambda i: (0, 0))],
        out_specs=pl.BlockSpec(memory_space=pltpu.MemorySpace.SMEM),
        compiler_params=pltpu.CompilerParams(
            dimension_semantics=("arbitrary",),
            vmem_limit_bytes=min(vmem_limit, 64 * 1024 * 1024)),
    )(loss2d, r2d)
    return out[0, 0]


if __name__ == "__main__":
    key = jax.random.PRNGKey(0)
    k1, k2 = jax.random.split(key)
    N, C = 8, 32
    logits = jax.random.normal(k1, (N, C), dtype=jnp.float32)
    target = jax.random.randint(k2, (N,), 0, C, dtype=jnp.int32)

    loss = low_loss(logits, target, lamb=0.1)
    jax.block_until_ready(loss)

    assert loss.shape == ()
    assert bool(jnp.isfinite(loss))
    print("KERNEL_OK")
</pallas_src>

<mosaic_0001>
module attributes {stable_mosaic.version = 11 : i64} {
  func.func @_stats_kernel(%arg0: i32, %arg1: memref<8x32xf32, #tpu.memory_space<vmem>>, %arg2: memref<8x1xi32, #tpu.memory_space<vmem>>, %arg3: memref<8x1xf32, #tpu.memory_space<vmem>>, %arg4: memref<8x1xf32, #tpu.memory_space<vmem>>) attributes {dimension_semantics = [#tpu.dimension_semantics<parallel>], iteration_bounds = array<i64: 1>, scalar_prefetch = 0 : i64, scratch_operands = 0 : i64, tpu.core_type = #tpu.core_type<tc>, window_params = [{transform_indices = @transform_0, window_bounds = array<i64: 8, 32>}, {transform_indices = @transform_1, window_bounds = array<i64: 8, 1>}, {transform_indices = @transform_2, window_bounds = array<i64: 8, 1>}, {transform_indices = @transform_3, window_bounds = array<i64: 8, 1>}]} {
    %c0 = arith.constant 0 : index
    %c0_0 = arith.constant 0 : index
    %0 = vector.load %arg1[%c0, %c0_0] : memref<8x32xf32, #tpu.memory_space<vmem>>, vector<8x32xf32>
    %c0_1 = arith.constant 0 : index
    %c0_2 = arith.constant 0 : index
    %1 = vector.load %arg2[%c0_1, %c0_2] : memref<8x1xi32, #tpu.memory_space<vmem>>, vector<8x1xi32>
    %2 = tpu.iota {dimensions = array<i32: 1>} : vector<1x32xi32>
    %3 = vector.broadcast %2 : vector<1x32xi32> to vector<8x32xi32>
    %4 = vector.broadcast %1 : vector<8x1xi32> to vector<8x32xi32>
    %5 = arith.cmpi eq, %3, %4 : vector<8x32xi32>
    %cst = arith.constant dense<0xFF800000> : vector<8xf32>
    %6 = vector.multi_reduction <maximumf>, %0, %cst [1] : vector<8x32xf32> to vector<8xf32>
    %7 = vector.shape_cast %6 : vector<8xf32> to vector<8x1xf32>
    %8 = vector.broadcast %7 : vector<8x1xf32> to vector<8x32xf32>
    %9 = arith.subf %0, %8 : vector<8x32xf32>
    %10 = math.exp %9 : vector<8x32xf32>
    %cst_3 = arith.constant dense<0.000000e+00> : vector<8xf32>
    %11 = vector.multi_reduction <add>, %10, %cst_3 [1] : vector<8x32xf32> to vector<8xf32>
    %12 = vector.shape_cast %11 : vector<8xf32> to vector<8x1xf32>
    %13 = math.log %12 : vector<8x1xf32>
    %14 = arith.addf %7, %13 : vector<8x1xf32>
    %cst_4 = arith.constant 0.000000e+00 : f32
    %15 = vector.broadcast %cst_4 : f32 to vector<8x32xf32>
    %16 = arith.select %5, %0, %15 : vector<8x32xi1>, vector<8x32xf32>
    %cst_5 = arith.constant dense<0.000000e+00> : vector<8xf32>
    %17 = vector.multi_reduction <add>, %16, %cst_5 [1] : vector<8x32xf32> to vector<8xf32>
    %18 = vector.shape_cast %17 : vector<8xf32> to vector<8x1xf32>
    %19 = arith.subf %14, %18 : vector<8x1xf32>
    %20 = arith.subf %18, %14 : vector<8x1xf32>
    %21 = math.exp %20 : vector<8x1xf32>
    %22 = arith.mulf %10, %10 : vector<8x32xf32>
    %cst_6 = arith.constant dense<0.000000e+00> : vector<8xf32>
    %23 = vector.multi_reduction <add>, %22, %cst_6 [1] : vector<8x32xf32> to vector<8xf32>
    %24 = vector.shape_cast %23 : vector<8xf32> to vector<8x1xf32>
    %25 = arith.mulf %12, %12 : vector<8x1xf32>
    %26 = arith.divf %24, %25 : vector<8x1xf32>
    %cst_7 = arith.constant 2.000000e+00 : f32
    %27 = vector.broadcast %cst_7 : f32 to vector<8x1xf32>
    %28 = arith.mulf %27, %21 : vector<8x1xf32>
    %29 = arith.subf %26, %28 : vector<8x1xf32>
    %cst_8 = arith.constant 1.000000e+00 : f32
    %30 = vector.broadcast %cst_8 : f32 to vector<8x1xf32>
    %31 = arith.addf %29, %30 : vector<8x1xf32>
    %c0_9 = arith.constant 0 : index
    %c0_10 = arith.constant 0 : index
    %32 = vector.load %arg3[%c0_9, %c0_10] : memref<8x1xf32, #tpu.memory_space<vmem>>, vector<8x1xf32>
    tpu.vector_store %arg3[%c0_9, %c0_10], %19 {strides = array<i32>} : memref<8x1xf32, #tpu.memory_space<vmem>>, vector<8x1xf32>,
    %c0_11 = arith.constant 0 : index
    %c0_12 = arith.constant 0 : index
    %33 = vector.load %arg4[%c0_11, %c0_12] : memref<8x1xf32, #tpu.memory_space<vmem>>, vector<8x1xf32>
    tpu.vector_store %arg4[%c0_11, %c0_12], %31 {strides = array<i32>} : memref<8x1xf32, #tpu.memory_space<vmem>>, vector<8x1xf32>,
    return
  }
  func.func @transform_0(%arg0: i32) -> (i32, i32) {
    %c0_i32 = arith.constant 0 : i32
    %c0_i32_0 = arith.constant 0 : i32
    return %arg0, %c0_i32 : i32, i32
  }
  func.func @transform_1(%arg0: i32) -> (i32, i32) {
    %c0_i32 = arith.constant 0 : i32
    %c0_i32_0 = arith.constant 0 : i32
    return %arg0, %c0_i32 : i32, i32
  }
  func.func @transform_2(%arg0: i32) -> (i32, i32) {
    %c0_i32 = arith.constant 0 : i32
    %c0_i32_0 = arith.constant 0 : i32
    return %arg0, %c0_i32 : i32, i32
  }
  func.func @transform_3(%arg0: i32) -> (i32, i32) {
    %c0_i32 = arith.constant 0 : i32
    %c0_i32_0 = arith.constant 0 : i32
    return %arg0, %c0_i32 : i32, i32
  }
}

</mosaic_0001>

<bundles_post_ra>
// kernel: tpu_custom_call.1
= control target key start
LH: loop header
LB: loop body
LE: loop exit
PB: predicated region body
PF: predicated region fallthrough
CT: control target
= control target key end

     0   :  { %vm21_vm0 = vcmask 261120   ;;  %v73_v1 = vmov 0   ;;  %v15_v7 = vlaneseq  ;;  %vm52_vm2 = vcmask 7168   ;;  %s112_s0 = inlined_call_operand.vmem [shape: f32[8,32], index: 0, kind: input, shape index: {}]   ;;  %s113_s1 = inlined_call_operand.vmem [shape: s32[8,1], index: 1, kind: input, shape index: {}]   ;;  %s114_s2 = inlined_call_operand.vmem [shape: f32[8,1], index: 2, kind: output, shape index: {0}]   ;;  %s115_s3 = inlined_call_operand.vmem [shape: f32[8,1], index: 3, kind: output, shape index: {1}]  }
   0x1   :  { %v13_v0 = vld [vmem:[%s112_s0] sm:$0xff]  ;;  %64 = vset.pattern.permute.xlu0 %v73_v1 }
   0x2   :  { %v22_v2 = vsel %vm21_vm0, %v13_v0, -inf  ;;  %v14_v3 = vld [vmem:[%s113_s1] sm:$0xff]  ;;  %v16_v8 = vand.u32 127, %v15_v7 }
   0x3   :  { %23 = vmax.xlane.f32.xlu0 %v22_v2 }
  0x19   :  { %18 = vperm.xlu0 %64, %v14_v3  }
  0x90   :  { %v24_v4 = vpop.xlane.xlu0 %23 }
  0x91   :  { %v25_v5 = vsub.f32 %v13_v0, %v24_v4 }
  0x93   :  { %v26_v6 = vmul.f32 1.442695, %v25_v5 }
  0x95   :  { %65 = vpow2.f32 %v26_v6 }
  0x98   :  { %v19_v9 = vpop.permute.xlu0 %18 }
  0x99   :  { %vm20_vm1 = vcmp.eq.s32.totalorder %v16_v8, %v19_v9 }
  0x9a   :  { %v34_v11 = vsel %vm20_vm1, %v13_v0, 0.0 }
  0x9b   :  { %v35_v13 = vsel %vm21_vm0, %v34_v11, 0.0 }
  0x9f   :  { %v66_v10 = vpop.eup %65 }
  0xa0   :  { %v28_v12 = vsel %vm21_vm0, %v66_v10, 0.0  ;;  %v42_v14 = vmul.f32 %v66_v10, %v66_v10 }
  0xa1   :  { %29 = vadd.xlane.f32.xlu1 %v28_v12 }
  0xa2   :  { %v43_v15 = vsel %vm21_vm0, %v42_v14, 0.0 }
  0xa5   :  { %36 = vadd.xlane.f32.xlu1 %v35_v13 }
  0xa9   :  { %44 = vadd.xlane.f32.xlu1 %v43_v15 }
 0x12e   :  { %v30_v16 = vpop.xlane.xlu1 %29 }
 0x12f   :  { %67 = vlog2.f32 %v30_v16  ;;  %v46_v19 = vmul.f32 %v30_v16, %v30_v16 }
 0x131   :  { %69 = vrcp.f32 %v46_v19 }
 0x132   :  { %v37_v21 = vpop.xlane.xlu1 %36 }
 0x136   :  { %v45_v27 = vpop.xlane.xlu1 %44 }
 0x139   :  { %v68_v17 = vpop.eup %67 }
 0x13a   :  { %v32_v18 = vmul.f32 0.6931472, %v68_v17 }
 0x13b   :  { %v70_v25 = vpop.eup %69 }
 0x13c   :  { %v33_v20 = vadd.f32 %v32_v18, %v24_v4  ;;  %v48_v29 = vmul.f32 %v70_v25, %v45_v27 }
 0x13e   :  { %v38_v22 = vsub.f32 %v33_v20, %v37_v21  ;;  %v39_v23 = vsub.f32 %v37_v21, %v33_v20 }
 0x140   :  { %v40_v24 = vmul.f32 1.442695, %v39_v23  ;;  %53 = vst.msk [vmem:[%s114_s2] sm:$0xff] %vm52_vm2, %v38_v22 }
 0x142   :  { %71 = vpow2.f32 %v40_v24 }
 0x14c   :  { %v72_v26 = vpop.eup %71 }
 0x14d   :  { %v49_v28 = vmul.f32 2.0, %v72_v26 }
 0x14f   :  { %v50_v30 = vsub.f32 %v48_v29, %v49_v28 }
 0x151   :  { %v51_v31 = vadd.f32 1.0, %v50_v30 }
 0x153   :  { %54 = vst.msk [vmem:[%s115_s3] sm:$0xff] %vm52_vm2, %v51_v31 }

</bundles_post_ra>
